<compile_context>
chip_gen: v7x
topology: tpu7x:2x2x1
jax: 0.10.0
libtpu: 0.0.40
codegen_flags: <defaults>
</compile_context>

<pallas_src>
import jax
import jax.numpy as jnp
from jax.experimental import pallas as pl
from jax.experimental.pallas import tpu as pltpu

SUBLANE = 8


def _round_up(n: int, m: int) -> int:
    return (n + m - 1) // m * m


def decoder_kernel(z_ref,
                   w1_ref, b1_ref,
                   w2_ref, b2_ref,
                   w3_ref, b3_ref,
                   o_ref):
    """Fused MLP on one batch tile: (Linear+ReLU) x 3 then Sigmoid.

    Activations are cast to bf16 in front of each MXU dot; accumulation and the
    bias add / ReLU / sigmoid epilogue stay f32.
    """
    z = z_ref[...].astype(jnp.bfloat16)                           # (TB, z_dims)

    h = jnp.dot(z, w1_ref[...],
                preferred_element_type=jnp.float32) + b1_ref[...]
    h = jnp.maximum(h, 0.0)                                       # ReLU

    h = jnp.dot(h.astype(jnp.bfloat16), w2_ref[...],
                preferred_element_type=jnp.float32) + b2_ref[...]
    h = jnp.maximum(h, 0.0)                                       # ReLU

    h = jnp.dot(h.astype(jnp.bfloat16), w3_ref[...],
                preferred_element_type=jnp.float32) + b3_ref[...]
    h = jnp.maximum(h, 0.0)                                       # last Linear also has ReLU

    o_ref[...] = jax.nn.sigmoid(h)                                # Sigmoid, f32 store


def prepare_params(params):
    """Cast weights to bf16 (half the weight DMA bytes, native MXU rate).
    Biases stay f32. No output-feature padding anymore: the kernel writes 784 wide."""
    return [(w.astype(jnp.bfloat16), b.astype(jnp.float32)) for (w, b) in params]


def decoder_forward(z, prepared_params, x_dims, *, block_b=1024):
    """z: (B, z_dims) f32 -> (B, 1, 28, 28) f32."""
    (w1, b1), (w2, b2), (w3, b3) = prepared_params
    B, z_dims = z.shape

    # Tile selection:
    #   * at least 2 grid steps when the batch allows it (feeds both v7x cores),
    #   * tiles balanced across steps, 8-row aligned, capped at block_b,
    #   * tiny batches collapse to a single whole-array block (block dim == array
    #     dim is always legal, no 8-row rounding needed),
    #   * the final block may be ragged; Pallas masks its writes, so no batch
    #     padding and no post-kernel row slice are required.
    num_steps = max(pl.cdiv(B, block_b), 2)
    TB = _round_up(pl.cdiv(B, num_steps), SUBLANE)
    if TB >= B:
        TB = B
    grid = (pl.cdiv(B, TB),)

    out = pl.pallas_call(
        decoder_kernel,
        out_shape=jax.ShapeDtypeStruct((B, x_dims), jnp.float32),
        grid_spec=pltpu.PrefetchScalarGridSpec(
            num_scalar_prefetch=0,
            grid=grid,
            in_specs=[
                # batch-tiled activations
                pl.BlockSpec((TB, z_dims), lambda i: (i, 0)),
                # weights / biases stay VMEM-resident (same block every step)
                pl.BlockSpec(w1.shape, lambda i: (0, 0)),
                pl.BlockSpec(b1.shape, lambda i: (0, 0)),
                pl.BlockSpec(w2.shape, lambda i: (0, 0)),
                pl.BlockSpec(b2.shape, lambda i: (0, 0)),
                pl.BlockSpec(w3.shape, lambda i: (0, 0)),
                pl.BlockSpec(b3.shape, lambda i: (0, 0)),
            ],
            # true 784-wide output block (== full array dim): no padding, no slice
            out_specs=pl.BlockSpec((TB, x_dims), lambda i: (i, 0)),
        ),
        compiler_params=pltpu.CompilerParams(
            dimension_semantics=("parallel",),      # megacore sharding of batch tiles
            vmem_limit_bytes=48 * 1024 * 1024,      # headroom for TB=1024 on all gens
        ),
    )(z, w1, b1, w2, b2, w3, b3)

    # torch-style unflatten(-1, (1, 28, 28)) — metadata-only reshape, no copies.
    return out.reshape(B, 1, 28, 28)


def init_linear(key, fan_in, fan_out):
    """Deterministic init mimicking torch.nn.Linear default (U[-1/sqrt(in), 1/sqrt(in)])."""
    kw, kb = jax.random.split(key)
    bound = 1.0 / jnp.sqrt(jnp.float32(fan_in))
    # store weight as (in, out) so the kernel does x @ W (equiv. to torch x @ W.T)
    w = jax.random.uniform(kw, (fan_in, fan_out), jnp.float32, -bound, bound)
    b = jax.random.uniform(kb, (1, fan_out), jnp.float32, -bound, bound)
    return w, b


def make_decoder_params(key, x_dims, z_dims, hidden_dims):
    dims = [z_dims] + list(hidden_dims) + [x_dims]
    keys = jax.random.split(key, len(dims) - 1)
    return [init_linear(k, dims[i], dims[i + 1]) for i, k in enumerate(keys)]


def reference_forward(z, params, x_dims):
    """Pure-JAX reference with the same bf16-weight / f32-accumulate recipe."""
    h = z
    for (w, b) in params:
        h = jnp.dot(h.astype(jnp.bfloat16), w.astype(jnp.bfloat16),
                    preferred_element_type=jnp.float32) + b.astype(jnp.float32)
        h = jnp.maximum(h, 0.0)
    h = jax.nn.sigmoid(h)
    return h.reshape(z.shape[0], 1, 28, 28)


if __name__ == "__main__":
    key = jax.random.PRNGKey(0)
    k_param, k_z1, k_z2 = jax.random.split(key, 3)

    # Module config: Decoder(x_dims=784, z_dims=32, hidden_dims=[64, 128])
    x_dims, z_dims = 28 * 28, 32
    hidden_dims = [64, 128]

    params = make_decoder_params(k_param, x_dims, z_dims, hidden_dims)
    prepared = prepare_params(params)

    # Small-shape check (B=2): single whole-array block (block dims == array dims).
    B = 2
    z = jax.random.normal(k_z1, (B, z_dims), dtype=jnp.float32)
    out = jax.block_until_ready(decoder_forward(z, prepared, x_dims))
    assert out.shape == (B, 1, 28, 28), out.shape
    ref = reference_forward(z, params, x_dims)
    assert jnp.allclose(out, ref, atol=2e-3, rtol=2e-3), float(jnp.abs(out - ref).max())

    # Multi-step check (B=300 -> two 152-row tiles, ragged masked final block).
    B2 = 300
    z2 = jax.random.normal(k_z2, (B2, z_dims), dtype=jnp.float32)
    out2 = jax.block_until_ready(decoder_forward(z2, prepared, x_dims))
    assert out2.shape == (B2, 1, 28, 28), out2.shape
    ref2 = reference_forward(z2, params, x_dims)
    assert jnp.allclose(out2, ref2, atol=2e-3, rtol=2e-3), float(jnp.abs(out2 - ref2).max())

    print("KERNEL_OK")
</pallas_src>

<mosaic_0001>
module attributes {stable_mosaic.version = 11 : i64} {
  func.func @decoder_kernel(%arg0: i32, %arg1: memref<2x32xf32, #tpu.memory_space<vmem>>, %arg2: memref<32x64xbf16, #tpu.memory_space<vmem>>, %arg3: memref<1x64xf32, #tpu.memory_space<vmem>>, %arg4: memref<64x128xbf16, #tpu.memory_space<vmem>>, %arg5: memref<1x128xf32, #tpu.memory_space<vmem>>, %arg6: memref<128x784xbf16, #tpu.memory_space<vmem>>, %arg7: memref<1x784xf32, #tpu.memory_space<vmem>>, %arg8: memref<2x784xf32, #tpu.memory_space<vmem>>) attributes {dimension_semantics = [#tpu.dimension_semantics<parallel>], iteration_bounds = array<i64: 1>, scalar_prefetch = 0 : i64, scratch_operands = 0 : i64, tpu.core_type = #tpu.core_type<tc>, window_params = [{transform_indices = @transform_0, window_bounds = array<i64: 2, 32>}, {pipeline_mode = #tpu.pipeline_mode<synchronous>, transform_indices = @transform_1, window_bounds = array<i64: 32, 64>}, {pipeline_mode = #tpu.pipeline_mode<synchronous>, transform_indices = @transform_2, window_bounds = array<i64: 1, 64>}, {pipeline_mode = #tpu.pipeline_mode<synchronous>, transform_indices = @transform_3, window_bounds = array<i64: 64, 128>}, {pipeline_mode = #tpu.pipeline_mode<synchronous>, transform_indices = @transform_4, window_bounds = array<i64: 1, 128>}, {pipeline_mode = #tpu.pipeline_mode<synchronous>, transform_indices = @transform_5, window_bounds = array<i64: 128, 784>}, {pipeline_mode = #tpu.pipeline_mode<synchronous>, transform_indices = @transform_6, window_bounds = array<i64: 1, 784>}, {transform_indices = @transform_7, window_bounds = array<i64: 2, 784>}]} {
    %c0 = arith.constant 0 : index
    %c0_0 = arith.constant 0 : index
    %0 = vector.load %arg1[%c0, %c0_0] : memref<2x32xf32, #tpu.memory_space<vmem>>, vector<2x32xf32>
    %1 = arith.truncf %0 : vector<2x32xf32> to vector<2x32xbf16>
    %c0_1 = arith.constant 0 : index
    %c0_2 = arith.constant 0 : index
    %2 = vector.load %arg2[%c0_1, %c0_2] : memref<32x64xbf16, #tpu.memory_space<vmem>>, vector<32x64xbf16>
    %cst = arith.constant dense<0.000000e+00> : vector<2x64xf32>
    %3 = tpu.matmul %1, %2, %cst {dimension_numbers = #tpu.dot_dimension_numbers<[1], [0], [0], [1], [0, 0, 1, 1], [], []>} : vector<2x32xbf16>, vector<32x64xbf16>, vector<2x64xf32> -> vector<2x64xf32>
    %c0_3 = arith.constant 0 : index
    %c0_4 = arith.constant 0 : index
    %4 = vector.load %arg3[%c0_3, %c0_4] : memref<1x64xf32, #tpu.memory_space<vmem>>, vector<1x64xf32>
    %5 = vector.broadcast %4 : vector<1x64xf32> to vector<2x64xf32>
    %6 = arith.addf %3, %5 : vector<2x64xf32>
    %cst_5 = arith.constant 0.000000e+00 : f32
    %7 = vector.broadcast %cst_5 : f32 to vector<2x64xf32>
    %8 = arith.maximumf %6, %7 : vector<2x64xf32>
    %9 = arith.truncf %8 : vector<2x64xf32> to vector<2x64xbf16>
    %c0_6 = arith.constant 0 : index
    %c0_7 = arith.constant 0 : index
    %10 = vector.load %arg4[%c0_6, %c0_7] : memref<64x128xbf16, #tpu.memory_space<vmem>>, vector<64x128xbf16>
    %cst_8 = arith.constant dense<0.000000e+00> : vector<2x128xf32>
    %11 = tpu.matmul %9, %10, %cst_8 {dimension_numbers = #tpu.dot_dimension_numbers<[1], [0], [0], [1], [0, 0, 1, 1], [], []>} : vector<2x64xbf16>, vector<64x128xbf16>, vector<2x128xf32> -> vector<2x128xf32>
    %c0_9 = arith.constant 0 : index
    %c0_10 = arith.constant 0 : index
    %12 = vector.load %arg5[%c0_9, %c0_10] : memref<1x128xf32, #tpu.memory_space<vmem>>, vector<1x128xf32>
    %13 = vector.broadcast %12 : vector<1x128xf32> to vector<2x128xf32>
    %14 = arith.addf %11, %13 : vector<2x128xf32>
    %cst_11 = arith.constant 0.000000e+00 : f32
    %15 = vector.broadcast %cst_11 : f32 to vector<2x128xf32>
    %16 = arith.maximumf %14, %15 : vector<2x128xf32>
    %17 = arith.truncf %16 : vector<2x128xf32> to vector<2x128xbf16>
    %c0_12 = arith.constant 0 : index
    %c0_13 = arith.constant 0 : index
    %18 = vector.load %arg6[%c0_12, %c0_13] : memref<128x784xbf16, #tpu.memory_space<vmem>>, vector<128x784xbf16>
    %cst_14 = arith.constant dense<0.000000e+00> : vector<2x784xf32>
    %19 = tpu.matmul %17, %18, %cst_14 {dimension_numbers = #tpu.dot_dimension_numbers<[1], [0], [0], [1], [0, 0, 1, 1], [], []>} : vector<2x128xbf16>, vector<128x784xbf16>, vector<2x784xf32> -> vector<2x784xf32>
    %c0_15 = arith.constant 0 : index
    %c0_16 = arith.constant 0 : index
    %20 = vector.load %arg7[%c0_15, %c0_16] : memref<1x784xf32, #tpu.memory_space<vmem>>, vector<1x784xf32>
    %21 = vector.broadcast %20 : vector<1x784xf32> to vector<2x784xf32>
    %22 = arith.addf %19, %21 : vector<2x784xf32>
    %cst_17 = arith.constant 0.000000e+00 : f32
    %23 = vector.broadcast %cst_17 : f32 to vector<2x784xf32>
    %24 = arith.maximumf %22, %23 : vector<2x784xf32>
    %25 = arith.negf %24 : vector<2x784xf32>
    %26 = math.exp %25 : vector<2x784xf32>
    %cst_18 = arith.constant 1.000000e+00 : f32
    %27 = vector.broadcast %cst_18 : f32 to vector<2x784xf32>
    %28 = arith.addf %27, %26 : vector<2x784xf32>
    %29 = arith.divf %27, %28 : vector<2x784xf32>
    %c0_19 = arith.constant 0 : index
    %c0_20 = arith.constant 0 : index
    %30 = vector.load %arg8[%c0_19, %c0_20] : memref<2x784xf32, #tpu.memory_space<vmem>>, vector<2x784xf32>
    tpu.vector_store %arg8[%c0_19, %c0_20], %29 {strides = array<i32>} : memref<2x784xf32, #tpu.memory_space<vmem>>, vector<2x784xf32>,
    return
  }
  func.func @transform_0(%arg0: i32) -> (i32, i32) {
    %c0_i32 = arith.constant 0 : i32
    %c0_i32_0 = arith.constant 0 : i32
    return %arg0, %c0_i32 : i32, i32
  }
  func.func @transform_1(%arg0: i32) -> (i32, i32) {
    %c0_i32 = arith.constant 0 : i32
    %c0_i32_0 = arith.constant 0 : i32
    %c0_i32_1 = arith.constant 0 : i32
    return %c0_i32, %c0_i32_0 : i32, i32
  }
  func.func @transform_2(%arg0: i32) -> (i32, i32) {
    %c0_i32 = arith.constant 0 : i32
    %c0_i32_0 = arith.constant 0 : i32
    %c0_i32_1 = arith.constant 0 : i32
    return %c0_i32, %c0_i32_0 : i32, i32
  }
  func.func @transform_3(%arg0: i32) -> (i32, i32) {
    %c0_i32 = arith.constant 0 : i32
    %c0_i32_0 = arith.constant 0 : i32
    %c0_i32_1 = arith.constant 0 : i32
    return %c0_i32, %c0_i32_0 : i32, i32
  }
  func.func @transform_4(%arg0: i32) -> (i32, i32) {
    %c0_i32 = arith.constant 0 : i32
    %c0_i32_0 = arith.constant 0 : i32
    %c0_i32_1 = arith.constant 0 : i32
    return %c0_i32, %c0_i32_0 : i32, i32
  }
  func.func @transform_5(%arg0: i32) -> (i32, i32) {
    %c0_i32 = arith.constant 0 : i32
    %c0_i32_0 = arith.constant 0 : i32
    %c0_i32_1 = arith.constant 0 : i32
    return %c0_i32, %c0_i32_0 : i32, i32
  }
  func.func @transform_6(%arg0: i32) -> (i32, i32) {
    %c0_i32 = arith.constant 0 : i32
    %c0_i32_0 = arith.constant 0 : i32
    %c0_i32_1 = arith.constant 0 : i32
    return %c0_i32, %c0_i32_0 : i32, i32
  }
  func.func @transform_7(%arg0: i32) -> (i32, i32) {
    %c0_i32 = arith.constant 0 : i32
    %c0_i32_0 = arith.constant 0 : i32
    return %arg0, %c0_i32 : i32, i32
  }
}

</mosaic_0001>

<bundles_post_ra>
// kernel: tpu_custom_call.1
= control target key start
LH: loop header
LB: loop body
LE: loop exit
PB: predicated region body
PF: predicated region fallthrough
CT: control target
= control target key end

     0   :  { %v1121_v1 = vmov 0.0   ;;  %vm1122_vm0 = vmmov 0   ;;  %vm53_vm1 = vcmask 261120   ;;  %s1396_s0 = inlined_call_operand.vmem [shape: f32[2,32], index: 0, kind: input, shape index: {}]   ;;  %s1397_s1 = inlined_call_operand.vmem [shape: bf16[32,64], index: 1, kind: input, shape index: {}]   ;;  %s1398_s2 = inlined_call_operand.vmem [shape: f32[1,64], index: 2, kind: input, shape index: {}]   ;;  %s1399_s3 = inlined_call_operand.vmem [shape: bf16[64,128], index: 3, kind: input, shape index: {}]   ;;  %s1400_s4 = inlined_call_operand.vmem [shape: f32[1,128], index: 4, kind: input, shape index: {}]   ;;  %s1401_s5 = inlined_call_operand.vmem [shape: bf16[128,784], index: 5, kind: input, shape index: {}]   ;;  %s1402_s6 = inlined_call_operand.vmem [shape: f32[1,784], index: 6, kind: input, shape index: {}]   ;;  %s1403_s7 = inlined_call_operand.hbm [shape: f32[2,784], index: 7, kind: output, shape index: {}]  }
   0x1   :  { %v983_v0 = vld [vmem:[%s1397_s1] sm:$0xff]   ;;  %938 = vmatprep.subr.bf16.mxu0 %v1121_v1  ;;  %v984_v2 = vld [vmem:[%s1397_s1 + $0x8] sm:$0xff]   ;;  %946 = vmatprep.subr.bf16.mxu1 %v1121_v1 }
   0x2   :  { %939 = vmatpush3.bf16.msra.mxu0 %v983_v0  ;;  %942 = vmatprep.mubr.msk.bf16.mxu0 %vm1122_vm0, %v1121_v1  ;;  %v28_v3 = vld [vmem:[%s1396_s0] sm:$0x3]  ;;  %v986_v5 = vld [vmem:[%s1399_s3 + $0x8] sm:$0xff]  }
   0x3   :  { %v985_v4 = vld [vmem:[%s1399_s3] sm:$0xff]   ;;  %940 = vmatprep.subr.bf16.mxu0 %v1121_v1  ;;  %954 = vmatprep.mubr.msk.bf16.mxu1 %vm1122_vm0, %v1121_v1  ;;  %v29_v6 = vpack.c.bf16 %v28_v3, %v28_v3 }
   0x4   :  { %947 = vmatpush3.bf16.msra.mxu1 %v985_v4 }
   0x5   :  { %948 = vmatprep.subr.bf16.mxu1 %v1121_v1 }
   0x6   :  { %941 = vmatpush3.bf16.msra.mxu0 %v984_v2 }
   0x8   :  { %949 = vmatpush3.bf16.msra.mxu1 %v986_v5 }
   0x9   :  { %943 = vmatmul.mubr.msk.bf16.vlgmr.msra.gmra.mrb[0].mxu0 %vm53_vm1, %v29_v6  ;;  %950 = vmatprep.subr.bf16.mxu1 %v1121_v1 }
   0xa   :  { %12 = vsyncpa [#allocation3], 0  ;;  %v987_v7 = vld [vmem:[%s1399_s3 + $0x10] sm:$0xff]   ;;  %v988_v8 = vld [vmem:[%s1399_s3 + $0x18] sm:$0xff]   ;;  %vm138_vm2 = vcmask 523264   ;;  %v1123_v50 = vmov 0  }
   0xb   :  { %v989_v9 = vld [vmem:[%s1401_s5] ss:$28 sps:$4 sm:$0xff]   ;;  %v994_v11 = vld [vmem:[%s1401_s5 + $0xc] ss:$28 sps:$4 sm:$0xff]   ;;  %v995_v13 = vld [vmem:[%s1401_s5 + $0x38] ss:$28 sps:$4 sm:$0xff]   ;;  %605 = vmatprep.mubr.bf16.mxu0 %v1123_v50 }
   0xc   :  { %951 = vmatpush3.bf16.msra.mxu1 %v987_v7  ;;  %v991_v10 = vld [vmem:[%s1401_s5 + $0x4] ss:$28 sps:$4 sm:$0xff]   ;;  %v997_v12 = vld [vmem:[%s1401_s5 + $0x3c] ss:$28 sps:$4 sm:$0xff]   ;;  %v1003_v14 = vld [vmem:[%s1401_s5 + $0x74] ss:$28 sps:$4 sm:$0xff]  }
   0xd   :  { %952 = vmatprep.subr.bf16.mxu1 %v1121_v1  ;;  %573 = vmatprep.subr.bf16.mxu0 %v991_v10  ;;  %v1001_v15 = vld [vmem:[%s1401_s5 + $0x70] ss:$28 sps:$4 sm:$0xff]   ;;  %v1007_v17 = vld [vmem:[%s1401_s5 + $0xa8] ss:$28 sps:$4 sm:$0xff]   ;;  %v1013_v19 = vld [vmem:[%s1401_s5 + $0xe0] ss:$28 sps:$4 sm:$0xff]  }
   0xe   :  { %574 = vmatpush1.bf16.msra.mxu0 %v989_v9  ;;  %v1009_v16 = vld [vmem:[%s1401_s5 + $0xac] ss:$28 sps:$4 sm:$0xff]   ;;  %v1015_v18 = vld [vmem:[%s1401_s5 + $0xe4] ss:$28 sps:$4 sm:$0xff]   ;;  %v1021_v20 = vld [vmem:[%s1401_s5 + $0x11c] ss:$28 sps:$4 sm:$0xff]  }
   0xf   :  { %575 = vmatprep.subr.bf16.mxu0 %v997_v12  ;;  %v1019_v21 = vld [vmem:[%s1401_s5 + $0x118] ss:$28 sps:$4 sm:$0xff]   ;;  %v1025_v23 = vld [vmem:[%s1401_s5 + $0x150] ss:$28 sps:$4 sm:$0xff]   ;;  %v848_v24 = vld [vmem:[%s1398_s2] ss:$0 sm:$0xff] }
  0x10   :  { %953 = vmatpush3.bf16.msra.mxu1 %v988_v8  ;;  %v1027_v22 = vld [vmem:[%s1401_s5 + $0x154] ss:$28 sps:$4 sm:$0xff]   ;;  %v992_v31 = vld [vmem:[%s1401_s5 + $0x8] ss:$28 sps:$4 sm:$0xff]   ;;  %v998_v34 = vld [vmem:[%s1401_s5 + $0x40] ss:$28 sps:$4 sm:$0xff]  }
  0x11   :  { %614 = vmatprep.subr.bf16.mxu1 %v994_v11  ;;  %v1000_v33 = vld [vmem:[%s1401_s5 + $0x44] ss:$28 sps:$4 sm:$0xff]   ;;  %v1006_v35 = vld [vmem:[%s1401_s5 + $0x7c] ss:$28 sps:$4 sm:$0xff]   ;;  %v1012_v37 = vld [vmem:[%s1401_s5 + $0xb4] ss:$28 sps:$4 sm:$0xff]  }
  0x12   :  { %576 = vmatpush1.bf16.msra.mxu0 %v995_v13  ;;  %v1004_v36 = vld [vmem:[%s1401_s5 + $0x78] ss:$28 sps:$4 sm:$0xff]   ;;  %v1010_v38 = vld [vmem:[%s1401_s5 + $0xb0] ss:$28 sps:$4 sm:$0xff]   ;;  %v1016_v40 = vld [vmem:[%s1401_s5 + $0xe8] ss:$28 sps:$4 sm:$0xff]  }
  0x13   :  { %577 = vmatprep.subr.bf16.mxu0 %v1003_v14  ;;  %v1018_v39 = vld [vmem:[%s1401_s5 + $0xec] ss:$28 sps:$4 sm:$0xff]   ;;  %v1024_v41 = vld [vmem:[%s1401_s5 + $0x124] ss:$28 sps:$4 sm:$0xff]   ;;  %v1030_v43 = vld [vmem:[%s1401_s5 + $0x15c] ss:$28 sps:$4 sm:$0xff]  }
  0x14   :  { %v1022_v42 = vld [vmem:[%s1401_s5 + $0x120] ss:$28 sps:$4 sm:$0xff]   ;;  %v1028_v44 = vld [vmem:[%s1401_s5 + $0x158] ss:$28 sps:$4 sm:$0xff]   ;;  %v1033_v45 = vld [vmem:[%s1401_s5 + $0x18c] ss:$28 sps:$4 sm:$0xff]  }
  0x15   :  { %v1036_v46 = vld [vmem:[%s1401_s5 + $0x194] ss:$28 sps:$4 sm:$0xff]   ;;  %v1031_v47 = vld [vmem:[%s1401_s5 + $0x188] ss:$28 sps:$4 sm:$0xff]   ;;  %v852_v51 = vld [vmem:[%s1400_s4] ss:$0 sm:$0xff] }
  0x16   :  { %578 = vmatpush1.bf16.msra.mxu0 %v1001_v15  ;;  %v1034_v48 = vld [vmem:[%s1401_s5 + $0x190] ss:$28 sps:$4 sm:$0xff]   ;;  %v1040_v59 = vld [vmem:[%s1401_s5 + $0x18] ss:$28 sps:$4 sm:$0xff]   ;;  %v1041_v62 = vld [vmem:[%s1401_s5 + $0x48] ss:$28 sps:$4 sm:$0xff]  }
  0x17   :  { %579 = vmatprep.subr.bf16.mxu0 %v1009_v16  ;;  %v1039_v49 = vld [vmem:[%s1401_s5 + $0x14] ss:$28 sps:$4 sm:$0xff]   ;;  %v1043_v61 = vld [vmem:[%s1401_s5 + $0x4c] ss:$28 sps:$4 sm:$0xff]   ;;  %v1047_v0 = vld [vmem:[%s1401_s5 + $0x84] ss:$28 sps:$4 sm:$0xff]  }
  0x18   :  { %v1037_v58 = vld [vmem:[%s1401_s5 + $0x10] ss:$28 sps:$4 sm:$0xff]   ;;  %v1045_v2 = vld [vmem:[%s1401_s5 + $0x80] ss:$28 sps:$4 sm:$0xff]   ;;  %v1048_v3 = vld [vmem:[%s1401_s5 + $0x88] ss:$28 sps:$4 sm:$0xff]  }
  0x19   :  { %v1044_v63 = vld [vmem:[%s1401_s5 + $0x50] ss:$28 sps:$4 sm:$0xff]   ;;  %v1051_v4 = vld [vmem:[%s1401_s5 + $0xbc] ss:$28 sps:$4 sm:$0xff]   ;;  %v1057_v11 = vld [vmem:[%s1401_s5 + $0x128] ss:$28 sps:$4 sm:$0xff]  }
  0x1a   :  { %580 = vmatpush1.bf16.msra.mxu0 %v1007_v17  ;;  %v1049_v5 = vld [vmem:[%s1401_s5 + $0xb8] ss:$28 sps:$4 sm:$0xff]   ;;  %v1052_v6 = vld [vmem:[%s1401_s5 + $0xc0] ss:$28 sps:$4 sm:$0xff]   ;;  %v1053_v8 = vld [vmem:[%s1401_s5 + $0xf0] ss:$28 sps:$4 sm:$0xff]  }
  0x1b   :  { %581 = vmatprep.subr.bf16.mxu0 %v1015_v18  ;;  %v1055_v7 = vld [vmem:[%s1401_s5 + $0xf4] ss:$28 sps:$4 sm:$0xff]   ;;  %v1059_v10 = vld [vmem:[%s1401_s5 + $0x12c] ss:$28 sps:$4 sm:$0xff]   ;;  %v1063_v13 = vld [vmem:[%s1401_s5 + $0x164] ss:$28 sps:$4 sm:$0xff]  }
  0x1c   :  { %v1056_v9 = vld [vmem:[%s1401_s5 + $0xf8] ss:$28 sps:$4 sm:$0xff]   ;;  %v1060_v12 = vld [vmem:[%s1401_s5 + $0x130] ss:$28 sps:$4 sm:$0xff]   ;;  %v1061_v14 = vld [vmem:[%s1401_s5 + $0x160] ss:$28 sps:$4 sm:$0xff]  }
  0x1d   :  { %v1064_v15 = vld [vmem:[%s1401_s5 + $0x168] ss:$28 sps:$4 sm:$0xff]   ;;  %v1067_v16 = vld [vmem:[%s1401_s5 + $0x19c] ss:$28 sps:$4 sm:$0xff]   ;;  %vm828_vm3 = vcmask 1041408   ;;  %vm829_vm4 = vcmask 1043458  }
  0x1e   :  { %582 = vmatpush1.bf16.msra.mxu0 %v1013_v19  ;;  %v1065_v17 = vld [vmem:[%s1401_s5 + $0x198] ss:$28 sps:$4 sm:$0xff]   ;;  %v1068_v18 = vld [vmem:[%s1401_s5 + $0x1a0] ss:$28 sps:$4 sm:$0xff]   ;;  %v250_v19 = vlaneseq  ;;  %vm830_vm5 = vmor %vm829_vm4, %vm828_vm3  ;;  %vm831_vm6 = vcmask 128004   ;;  %s1125_s5 = smov [#allocation2]  }
  0x1f   :  { %583 = vmatprep.subr.bf16.mxu0 %v1021_v20  ;;  %vm832_vm7 = vmor %vm831_vm6, %vm830_vm5 }
  0x20   :  { %v251_v20 = vshrl.u32 %v250_v19, 7 }
  0x22   :  { %584 = vmatpush1.bf16.msra.mxu0 %v1019_v21  ;;  %v252_v21 = vsub.s32 0, %v251_v20 }
  0x23   :  { %585 = vmatprep.subr.bf16.mxu0 %v1027_v22  ;;  %v260_v22 = vsub.s32 2, %v251_v20 }
  0x26   :  { %586 = vmatpush1.bf16.msra.mxu0 %v1025_v23  ;;  %v248_v23 = vld [vmem:[%s1402_s6] sm:$0x7f]  ;;  %s840_s6 = sshll.u32 %s1125_s5, 4  ;;  %s841_s6 = int_to_ptr.vmem [resolvable:$true] %s840_s6 }
  0x27   :  { %587 = vmatprep.subr.bf16.mxu0 %v1033_v45  ;;  %s1097_s21 = scalar_lea.vmem %s841_s6, 224  ;;  %p1102_p1 = scmp.lt.s32.totalorder %s841_s6, %s841_s6 }
  0x28   :  { %p1098_p0 = scmp.ne.s32.totalorder %s841_s6, %s1097_s21  ;;  %p1103_p2 = scmp.lt.s32.totalorder %s1097_s21, %s1097_s21 }
  0x2a   :  { %588 = vmatpush1.bf16.msra.mxu0 %v1031_v47  ;;  %p1104_p3 = por %p1103_p2, %p1102_p1 }
  0x2b   :  { %655 = vmatprep.subr.bf16.mxu0 %v1039_v49 }
  0x2c   :  { %p1105_p4 = pnand %p1104_p3, %p1098_p0 }
  0xdc   :  { %v91_v25 = vpop.f32.mrb[0].mxu0 }
  0xdd   :  { %v92_v26 = vadd.f32 %v848_v24, %v91_v25  ;;  %v944_v27 = vpop.f32.mrb[1].mxu0  ;;  %v256_v24 = vsub.s32 1, %v251_v20  ;;  %v264_v25 = vsub.s32 3, %v251_v20 }
  0xde   :  { %v94_v28 = vpop.f32.mrb[2].mxu0  ;;  %v261_v27 = vrot.slane %v248_v23, %v260_v22 }
  0xdf   :  { %v97_v29 = vmax.f32 %v92_v26, 0.0  ;;  %v945_v30 = vpop.f32.mrb[3].mxu0  ;;  %v253_v26 = vrot.slane %v248_v23, %v252_v21  ;;  %v257_v28 = vrot.slane %v248_v23, %v256_v24 }
  0xe1   :  { %v98_v32 = vpack.c.bf16 %v97_v29, %v97_v29  ;;  %v265_v29 = vrot.slane %v248_v23, %v264_v25 }
  0xe3   :  { %955 = vmatmul.mubr.msk.bf16.vlgmr.msra.gmra.mrb[0].mxu1 %vm138_vm2, %v98_v32 }
  0xe4   :  { %615 = vmatpush1.bf16.msra.mxu1 %v992_v31  ;;  %646 = vmatprep.mubr.bf16.mxu1 %v1123_v50 }
  0xe5   :  { %616 = vmatprep.subr.bf16.mxu1 %v1000_v33 }
  0xe8   :  { %617 = vmatpush1.bf16.msra.mxu1 %v998_v34 }
  0xe9   :  { %618 = vmatprep.subr.bf16.mxu1 %v1006_v35 }
  0xec   :  { %619 = vmatpush1.bf16.msra.mxu1 %v1004_v36 }
  0xed   :  { %620 = vmatprep.subr.bf16.mxu1 %v1012_v37 }
  0xf0   :  { %621 = vmatpush1.bf16.msra.mxu1 %v1010_v38 }
  0xf1   :  { %622 = vmatprep.subr.bf16.mxu1 %v1018_v39 }
  0xf4   :  { %623 = vmatpush1.bf16.msra.mxu1 %v1016_v40 }
  0xf5   :  { %624 = vmatprep.subr.bf16.mxu1 %v1024_v41 }
  0xf8   :  { %625 = vmatpush1.bf16.msra.mxu1 %v1022_v42 }
  0xf9   :  { %626 = vmatprep.subr.bf16.mxu1 %v1030_v43 }
  0xfc   :  { %627 = vmatpush1.bf16.msra.mxu1 %v1028_v44 }
  0xfd   :  { %628 = vmatprep.subr.bf16.mxu1 %v1036_v46 }
 0x100   :  { %629 = vmatpush1.bf16.msra.mxu1 %v1034_v48 }
 0x101   :  { %958 = vmatprep.subr.bf16.mxu1 %v1121_v1 }
 0x1b6   :  { %v176_v52 = vpop.f32.mrb[0].mxu1 }
 0x1b7   :  { %v177_v53 = vadd.f32 %v852_v51, %v176_v52  ;;  %v956_v54 = vpop.f32.mrb[1].mxu1 }
 0x1b8   :  { %v179_v55 = vpop.f32.mrb[2].mxu1 }
 0x1b9   :  { %v182_v56 = vmax.f32 %v177_v53, 0.0  ;;  %v957_v57 = vpop.f32.mrb[3].mxu1 }
 0x1ba   :  { %v1124_v57 = vmov 1983009808  }
 0x1bb   :  { %v183_v60 = vpack.c.bf16 %v182_v56, %v182_v56 }
 0x1bd   :  { %606 = vmatmul.mubr.bf16.vlgmr.msra.gmra.mrb[4].mxu0 %v183_v60  ;;  %647 = vmatmul.mubr.bf16.vlgmr.msra.gmra.mrb[4].mxu1 %v183_v60 }
 0x1be   :  { %656 = vmatpush1.bf16.msra.mxu0 %v1037_v58  ;;  %959 = vmatpush3.bf16.msra.mxu1 %v1040_v59  ;;  %v795_v58 = vunpack.c.l.s4 %v1124_v57  ;;  %v268_v59 = vsub.s32 4, %v251_v20 }
 0x1bf   :  { %657 = vmatprep.subr.bf16.mxu0 %v1043_v61  ;;  %960 = vmatprep.subr.bf16.mxu1 %v1121_v1  ;;  %v272_v61 = vsub.s32 5, %v251_v20 }
 0x1c0   :  { %687 = vmatprep.mubr.bf16.mxu0 %v1123_v50  ;;  %974 = vmatprep.mubr.msk.bf16.mxu1 %vm1122_vm0, %v1121_v1 }
 0x1c2   :  { %658 = vmatpush1.bf16.msra.mxu0 %v1041_v62  ;;  %961 = vmatpush3.bf16.msra.mxu1 %v1044_v63  ;;  %v796_v62 = vunpack.c.0.s8 %v795_v58  ;;  %v269_v63 = vrot.slane %v248_v23, %v268_v59 }
 0x1c3   :  { %659 = vmatprep.subr.bf16.mxu0 %v1047_v0  ;;  %962 = vmatprep.subr.bf16.mxu1 %v1121_v1 }
 0x1c6   :  { %660 = vmatpush1.bf16.msra.mxu0 %v1045_v2  ;;  %963 = vmatpush3.bf16.msra.mxu1 %v1048_v3  ;;  %v273_v3 = vrot.slane %v248_v23, %v272_v61 }
 0x1c7   :  { %661 = vmatprep.subr.bf16.mxu0 %v1051_v4  ;;  %964 = vmatprep.subr.bf16.mxu1 %v1121_v1 }
 0x1ca   :  { %662 = vmatpush1.bf16.msra.mxu0 %v1049_v5  ;;  %965 = vmatpush3.bf16.msra.mxu1 %v1052_v6  ;;  %v799_v5 = vsub.s32 %v796_v62, %v251_v20 }
 0x1cb   :  { %663 = vmatprep.subr.bf16.mxu0 %v1055_v7  ;;  %966 = vmatprep.subr.bf16.mxu1 %v1121_v1 }
 0x1ce   :  { %664 = vmatpush1.bf16.msra.mxu0 %v1053_v8  ;;  %967 = vmatpush3.bf16.msra.mxu1 %v1056_v9 }
 0x1cf   :  { %665 = vmatprep.subr.bf16.mxu0 %v1059_v10  ;;  %968 = vmatprep.subr.bf16.mxu1 %v1121_v1 }
 0x1d2   :  { %666 = vmatpush1.bf16.msra.mxu0 %v1057_v11  ;;  %969 = vmatpush3.bf16.msra.mxu1 %v1060_v12 }
 0x1d3   :  { %667 = vmatprep.subr.bf16.mxu0 %v1063_v13  ;;  %970 = vmatprep.subr.bf16.mxu1 %v1121_v1 }
 0x1d6   :  { %668 = vmatpush1.bf16.msra.mxu0 %v1061_v14  ;;  %971 = vmatpush3.bf16.msra.mxu1 %v1064_v15 }
 0x1d7   :  { %669 = vmatprep.subr.bf16.mxu0 %v1067_v16  ;;  %972 = vmatprep.subr.bf16.mxu1 %v1121_v1 }
 0x1da   :  { %670 = vmatpush1.bf16.msra.mxu0 %v1065_v17  ;;  %973 = vmatpush3.bf16.msra.mxu1 %v1068_v18 }
 0x1dd   :  { %688 = vmatmul.mubr.bf16.vlgmr.msra.gmra.mrb[8].mxu0 %v183_v60  ;;  %975 = vmatmul.mubr.bf16.vlgmr.msra.gmra.mrb[8].mxu1 %v183_v60  ;;  %v276_v60 = vsub.s32 6, %v251_v20 }
 0x1df   :  { %v277_v0 = vrot.slane %v248_v23, %v276_v60 }
 0x290   :  { %v607_v30 = vpop.f32.mrb[4].mxu0  ;;  %v648_v1 = vpop.f32.mrb[4].mxu1 }
 0x291   :  { %v608_v31 = vadd.f32 %v607_v30, %v253_v26  ;;  %v649_v32 = vadd.f32 %v648_v1, %v261_v27  ;;  %v609_v33 = vpop.f32.mrb[5].mxu0  ;;  %v650_v34 = vpop.f32.mrb[5].mxu1 }
 0x292   :  { %v610_v35 = vadd.f32 %v609_v33, %v257_v28  ;;  %v651_v36 = vadd.f32 %v650_v34, %v265_v29  ;;  %v611_v37 = vpop.f32.mrb[6].mxu0  ;;  %v652_v38 = vpop.f32.mrb[6].mxu1 }
 0x293   :  { %v736_v39 = vmax.f32 %v608_v31, 0.0  ;;  %v738_v40 = vmax.f32 %v649_v32, 0.0  ;;  %v612_v41 = vpop.f32.mrb[7].mxu0  ;;  %v653_v42 = vpop.f32.mrb[7].mxu1 }
 0x294   :  { %v737_v43 = vmax.f32 %v610_v35, 0.0  ;;  %v739_v44 = vmax.f32 %v651_v36, 0.0 }
 0x295   :  { %v914_v45 = vmul.f32 -1.442695, %v736_v39  ;;  %v916_v46 = vmul.f32 -1.442695, %v738_v40 }
 0x296   :  { %v915_v47 = vmul.f32 -1.442695, %v737_v43  ;;  %v917_v48 = vmul.f32 -1.442695, %v739_v44 }
 0x297   :  { %1069 = vpow2.f32 %v914_v45 }
 0x298   :  { %1071 = vpow2.f32 %v916_v46 }
 0x299   :  { %1073 = vpow2.f32 %v915_v47 }
 0x29a   :  { %1075 = vpow2.f32 %v917_v48 }
 0x2a1   :  { %v1070_v49 = vpop.eup %1069 }
 0x2a2   :  { %v1072_v50 = vpop.eup %1071  ;;  %v764_v51 = vadd.f32 1.0, %v1070_v49 }
 0x2a3   :  { %v1074_v52 = vpop.eup %1073  ;;  %v766_v53 = vadd.f32 1.0, %v1072_v50 }
 0x2a4   :  { %v1076_v54 = vpop.eup %1075  ;;  %1077 = vrcp.f32 %v764_v51  ;;  %v765_v55 = vadd.f32 1.0, %v1074_v52 }
 0x2a5   :  { %1079 = vrcp.f32 %v766_v53  ;;  %v767_v56 = vadd.f32 1.0, %v1076_v54 }
 0x2a6   :  { %1081 = vrcp.f32 %v765_v55 }
 0x2a7   :  { %1083 = vrcp.f32 %v767_v56 }
 0x2ae   :  { %v1078_v2 = vpop.eup %1077 }
 0x2af   :  { %v1080_v4 = vpop.eup %1079 }
 0x2b0   :  { %v1082_v6 = vpop.eup %1081  ;;  %v689_v7 = vpop.f32.mrb[8].mxu0 }
 0x2b1   :  { %v730_v8 = vpop.f32.mrb[8].mxu1  ;;  %v1084_v9 = vpop.eup %1083  ;;  %v690_v10 = vadd.f32 %v689_v7, %v269_v63  ;;  %v792_v14 = vcombine.low %v1078_v2, %v1082_v6 }
 0x2b2   :  { %v731_v11 = vadd.f32 %v730_v8, %v277_v0  ;;  %v691_v12 = vpop.f32.mrb[9].mxu0  ;;  %v976_v13 = vpop.f32.mrb[9].mxu1  ;;  %v793_v18 = vcombine.low %v1080_v4, %v1084_v9 }
 0x2b3   :  { %v692_v15 = vadd.f32 %v691_v12, %v273_v3  ;;  %v693_v16 = vpop.f32.mrb[10].mxu0  ;;  %v733_v17 = vpop.f32.mrb[10].mxu1  ;;  %v740_v19 = vmax.f32 %v690_v10, 0.0  ;;  %v800_v23 = vrot.slane %v792_v14, %v799_v5 }
 0x2b4   :  { %v742_v21 = vmax.f32 %v731_v11, 0.0  ;;  %v694_v22 = vpop.f32.mrb[11].mxu0  ;;  %v977_v24 = vpop.f32.mrb[11].mxu1  ;;  %v807_v20 = vrot.slane %v793_v18, %v799_v5 }
 0x2b5   :  { %v741_v25 = vmax.f32 %v692_v15, 0.0  ;;  %v918_v26 = vmul.f32 -1.442695, %v740_v19 }
 0x2b6   :  { %v920_v27 = vmul.f32 -1.442695, %v742_v21  ;;  %v808_v29 = vcombine.low %v800_v23, %v807_v20 }
 0x2b7   :  { %v919_v28 = vmul.f32 -1.442695, %v741_v25  ;;  %1085 = vpow2.f32 %v918_v26 }
 0x2b8   :  { %1087 = vpow2.f32 %v920_v27  ;;  %827 = vst [vmem:[#allocation2] sm:$0xff] %v808_v29 }
 0x2b9   :  { %1089 = vpow2.f32 %v919_v28 }
 0x2c1   :  { %v1086_v30 = vpop.eup %1085 }
 0x2c2   :  { %v1088_v1 = vpop.eup %1087  ;;  %v768_v31 = vadd.f32 1.0, %v1086_v30 }
 0x2c3   :  { %v1090_v32 = vpop.eup %1089  ;;  %v770_v33 = vadd.f32 1.0, %v1088_v1 }
 0x2c4   :  { %1091 = vrcp.f32 %v768_v31  ;;  %v769_v34 = vadd.f32 1.0, %v1090_v32 }
 0x2c5   :  { %1093 = vrcp.f32 %v770_v33 }
 0x2c6   :  { %1095 = vrcp.f32 %v769_v34 }
 0x2ce   :  { %v1092_v35 = vpop.eup %1091 }
 0x2cf   :  { %v1094_v36 = vpop.eup %1093 }
 0x2d0   :  { %v1096_v37 = vpop.eup %1095  ;;  %v823_v40 = vrot.slane %v1094_v36, %v799_v5 }
 0x2d1   :  { %v809_v38 = vcombine.low %v1092_v35, %v1096_v37 }
 0x2d3   :  { %v816_v39 = vrot.slane %v809_v38, %v799_v5 }
 0x2d5   :  { %v824_v41 = vcombine.low %v816_v39, %v823_v40 }
 0x2d7   :  { %833 = vst.msk [vmem:[#allocation2 + $0x8] sm:$0x3f] %vm832_vm7, %v824_v41 }
 0x2d8   :  { %1108 = shalt.err (!%p1105_p4)
}
 0x2d9   :  { %s1109_s23 = scalar_lea.hbm %s1403_s7, 224 }
 0x2da   :  { %p1110_p5 = scmp.ne.s32.totalorder %s1403_s7, %s1109_s23  ;;  %p1113_p6 = scmp.lt.u32.totalorder %s1109_s23, %s1403_s7 }
 0x2dc   :  { %p1115_p7 = pnand %p1113_p6, %p1110_p5 }
 0x2de   :  { %1118 = shalt.err (!%p1115_p7)
}
 0x2df   :  { %843 = dma.vmem_to_hbm [thread:$0]  %s841_s6, 224, %s1403_s7, [#allocation3]  }
 0x2e0   :  { %1119 = dma.done.wait [#allocation3], 224  }
 0x2e1   :  { %1120 = vsyncadd [#allocation3], 4294967072 }
 0x2e2   :  { %847 = vsyncpa [#allocation3], 1 }

</bundles_post_ra>
